<compile_context>
chip_gen: v7x
topology: tpu7x:2x2x1
jax: 0.10.0
libtpu: 0.0.40
codegen_flags: <defaults>
</compile_context>

<pallas_src>
import jax
import jax.numpy as jnp
from jax.experimental import pallas as pl
from jax.experimental.pallas import tpu as pltpu

MID_CHANNEL = 32   # hidden channels
N = 4              # out channels of the final conv
L = 16             # Conv1d sequence length
M = L * N          # flattened output length: (B, L, N) -> (B, 1, M)
BATCH = 2
NUM_LAYERS = 6


def _cnn_kernel(x_ref, w_ref, b_ref, o_ref):
    """Whole network for one batch element (batch is the grid axis).

    x_ref : (L, 1)        input sample, length-major / channel-last
    w_ref : (6, 3*C, C)   packed weights; layer 0 taps in rows 0..2, layers
                          1..5 stored as three stacked (C, C) tap blocks
    b_ref : (6, 1, C)     packed biases (layer 6 zero-padded past N)
    o_ref : (L, C)        padded output (columns >= N are zero)
    """
    Lq = x_ref.shape[0]
    C = w_ref.shape[2]
    up, down = 1, Lq - 1                      # positive circular shifts

    # ---- layer 1 (Cin = 1): VPU broadcast multiply-add, no MXU round-trip ----
    x = x_ref[...]                            # (L, 1)
    xm = pltpu.roll(x, up, axis=0)            # circular x[t-1]
    xp = pltpu.roll(x, down, axis=0)          # circular x[t+1]
    w1 = w_ref[0, 0:3, :]                     # (3, C) -- only the 3 tap rows
    h = xm * w1[0:1, :] + x * w1[1:2, :] + xp * w1[2:3, :] + b_ref[0]
    h = jnp.maximum(h, 0.0)                   # (L, C)

    # ---- layers 2..6: three accumulating (L,C)x(C,C) dots per layer ----
    for i in range(1, NUM_LAYERS):
        hm = pltpu.roll(h, up, axis=0)        # circular left tap
        hp = pltpu.roll(h, down, axis=0)      # circular right tap
        y = (jnp.dot(hm, w_ref[i, 0:C, :],
                     preferred_element_type=jnp.float32)
             + jnp.dot(h, w_ref[i, C:2 * C, :],
                       preferred_element_type=jnp.float32)
             + jnp.dot(hp, w_ref[i, 2 * C:3 * C, :],
                       preferred_element_type=jnp.float32))
        y = y + b_ref[i]
        h = jnp.maximum(y, 0.0) if i < NUM_LAYERS - 1 else y

    o_ref[...] = h.astype(o_ref.dtype)


def init_params(key):
    """Deterministic per-layer Conv1d params (PyTorch-like uniform fan-in init).

    Each layer stored as (w_mat, b_row) with w_mat: (3, Cin, Cout),
    b_row: (1, Cout) -- i.e. torch weight (Cout, Cin, 3) transposed for matmul.
    """
    cfgs = [(1, MID_CHANNEL)] + [(MID_CHANNEL, MID_CHANNEL)] * 4 + [(MID_CHANNEL, N)]
    params = []
    for cin, cout in cfgs:
        key, kw, kb = jax.random.split(key, 3)
        bound = 1.0 / (cin * 3) ** 0.5
        w_torch = jax.random.uniform(kw, (cout, cin, 3), jnp.float32, -bound, bound)
        b = jax.random.uniform(kb, (cout,), jnp.float32, -bound, bound)
        w_mat = jnp.transpose(w_torch, (2, 1, 0))   # (3, Cin, Cout)
        params.append((w_mat, b.reshape(1, cout)))
    return params


def pack_params(params):
    """Pack the 6 layers into (6, 3C, C) weight and (6, 1, C) bias slabs.

    Called ONCE at init; the slabs are reused for every forward call.
    """
    C = MID_CHANNEL
    w_slab = jnp.zeros((NUM_LAYERS, 3 * C, C), jnp.float32)
    b_slab = jnp.zeros((NUM_LAYERS, 1, C), jnp.float32)
    # layer 1: (3, 1, C) tap weights stored in the first 3 rows of slab 0.
    w_slab = w_slab.at[0, :3, :].set(params[0][0][:, 0, :])
    b_slab = b_slab.at[0, 0, :].set(params[0][1][0])
    # layers 2..6: (3, C, Cout) -> three stacked (C, Cout) blocks, Cout padded to C.
    for i in range(1, NUM_LAYERS):
        w, b = params[i]
        cout = w.shape[2]
        w_slab = w_slab.at[i, :, :cout].set(w.reshape(3 * C, cout))
        b_slab = b_slab.at[i, 0, :cout].set(b[0])
    return w_slab, b_slab


@jax.jit
def cnn_forward(x_ncw, w_slab, b_slab):
    """x_ncw: (B, 1, L) float32, NCW like PyTorch. Returns (B, 1, M)."""
    B = x_ncw.shape[0]
    C = MID_CHANNEL
    x_lc = jnp.transpose(x_ncw, (0, 2, 1))          # (B, L, 1)

    out = pl.pallas_call(
        _cnn_kernel,
        out_shape=jax.ShapeDtypeStruct((B, L, C), jnp.float32),
        grid=(B,),
        in_specs=[
            pl.BlockSpec((None, L, 1), lambda b: (b, 0, 0)),
            pl.BlockSpec((NUM_LAYERS, 3 * C, C), lambda b: (0, 0, 0)),
            pl.BlockSpec((NUM_LAYERS, 1, C), lambda b: (0, 0, 0)),
        ],
        out_specs=pl.BlockSpec((None, L, C), lambda b: (b, 0, 0)),
        compiler_params=pltpu.CompilerParams(
            dimension_semantics=("parallel",)),
    )(x_lc, w_slab, b_slab)

    # PyTorch: (B, N, L) -> transpose(1, 2) -> (B, L, N) -> reshape (B, 1, M)
    return out[..., :N].reshape(B, 1, M)


def reference_forward(x_ncw, params):
    """Plain-JAX reference of the same circular Conv1d stack."""
    x = jnp.transpose(x_ncw, (0, 2, 1))             # (B, L, Cin)
    n_layers = len(params)
    for i, (w, b) in enumerate(params):
        xm = jnp.roll(x, 1, axis=1)
        xp = jnp.roll(x, -1, axis=1)
        y = xm @ w[0] + x @ w[1] + xp @ w[2] + b
        x = jnp.maximum(y, 0.0) if i < n_layers - 1 else y
    return x.reshape(x.shape[0], 1, M)


if __name__ == "__main__":
    key = jax.random.PRNGKey(0)
    kx, kp = jax.random.split(key)
    x = jax.random.normal(kx, (BATCH, 1, L), dtype=jnp.float32)
    params = init_params(kp)
    # Pack parameter slabs once, outside the per-call path.
    w_slab, b_slab = pack_params(params)
    w_slab, b_slab = jax.block_until_ready((w_slab, b_slab))

    out = cnn_forward(x, w_slab, b_slab)
    jax.block_until_ready(out)

    ref = reference_forward(x, params)
    assert out.shape == (BATCH, 1, M), out.shape
    assert jnp.allclose(out, ref, atol=1e-4, rtol=1e-4), "mismatch vs JAX reference"
    print("KERNEL_OK")
</pallas_src>

<mosaic_0001>
module attributes {stable_mosaic.version = 11 : i64} {
  func.func @_cnn_kernel(%arg0: i32, %arg1: memref<1x16x1xf32, #tpu.memory_space<vmem>>, %arg2: memref<6x96x32xf32, #tpu.memory_space<vmem>>, %arg3: memref<6x1x32xf32, #tpu.memory_space<vmem>>, %arg4: memref<1x16x32xf32, #tpu.memory_space<vmem>>) attributes {dimension_semantics = [#tpu.dimension_semantics<parallel>], iteration_bounds = array<i64: 2>, scalar_prefetch = 0 : i64, scratch_operands = 0 : i64, tpu.core_type = #tpu.core_type<tc>, window_params = [{transform_indices = @transform_0, window_bounds = array<i64: 1, 16, 1>}, {pipeline_mode = #tpu.pipeline_mode<synchronous>, transform_indices = @transform_1, window_bounds = array<i64: 6, 96, 32>}, {pipeline_mode = #tpu.pipeline_mode<synchronous>, transform_indices = @transform_2, window_bounds = array<i64: 6, 1, 32>}, {transform_indices = @transform_3, window_bounds = array<i64: 1, 16, 32>}]} {
    %c0 = arith.constant 0 : index
    %c0_0 = arith.constant 0 : index
    %c0_1 = arith.constant 0 : index
    %0 = vector.load %arg1[%c0, %c0_0, %c0_1] : memref<1x16x1xf32, #tpu.memory_space<vmem>>, vector<1x16x1xf32>
    %1 = vector.shape_cast %0 : vector<1x16x1xf32> to vector<16x1xf32>
    %c1_i32 = arith.constant 1 : i32
    %2 = tpu.dynamic_rotate %1 by %c1_i32 dim 0 : vector<16x1xf32>, i32 -> vector<16x1xf32>
    %c15_i32 = arith.constant 15 : i32
    %3 = tpu.dynamic_rotate %1 by %c15_i32 dim 0 : vector<16x1xf32>, i32 -> vector<16x1xf32>
    %c0_2 = arith.constant 0 : index
    %c0_3 = arith.constant 0 : index
    %c0_4 = arith.constant 0 : index
    %4 = vector.load %arg2[%c0_2, %c0_3, %c0_4] : memref<6x96x32xf32, #tpu.memory_space<vmem>>, vector<1x3x32xf32>
    %5 = vector.shape_cast %4 : vector<1x3x32xf32> to vector<3x32xf32>
    %6 = vector.extract_strided_slice %5 {offsets = [0, 0], sizes = [1, 32], strides = [1, 1]} : vector<3x32xf32> to vector<1x32xf32>
    %7 = vector.broadcast %2 : vector<16x1xf32> to vector<16x32xf32>
    %8 = vector.broadcast %6 : vector<1x32xf32> to vector<16x32xf32>
    %9 = arith.mulf %7, %8 : vector<16x32xf32>
    %10 = vector.extract_strided_slice %5 {offsets = [1, 0], sizes = [1, 32], strides = [1, 1]} : vector<3x32xf32> to vector<1x32xf32>
    %11 = vector.broadcast %1 : vector<16x1xf32> to vector<16x32xf32>
    %12 = vector.broadcast %10 : vector<1x32xf32> to vector<16x32xf32>
    %13 = arith.mulf %11, %12 : vector<16x32xf32>
    %14 = arith.addf %9, %13 : vector<16x32xf32>
    %15 = vector.extract_strided_slice %5 {offsets = [2, 0], sizes = [1, 32], strides = [1, 1]} : vector<3x32xf32> to vector<1x32xf32>
    %16 = vector.broadcast %3 : vector<16x1xf32> to vector<16x32xf32>
    %17 = vector.broadcast %15 : vector<1x32xf32> to vector<16x32xf32>
    %18 = arith.mulf %16, %17 : vector<16x32xf32>
    %19 = arith.addf %14, %18 : vector<16x32xf32>
    %c0_5 = arith.constant 0 : index
    %c0_6 = arith.constant 0 : index
    %c0_7 = arith.constant 0 : index
    %20 = vector.load %arg3[%c0_5, %c0_6, %c0_7] : memref<6x1x32xf32, #tpu.memory_space<vmem>>, vector<1x1x32xf32>
    %21 = vector.shape_cast %20 : vector<1x1x32xf32> to vector<1x32xf32>
    %22 = vector.broadcast %21 : vector<1x32xf32> to vector<16x32xf32>
    %23 = arith.addf %19, %22 : vector<16x32xf32>
    %cst = arith.constant 0.000000e+00 : f32
    %24 = vector.broadcast %cst : f32 to vector<16x32xf32>
    %25 = arith.maximumf %23, %24 : vector<16x32xf32>
    %c1_i32_8 = arith.constant 1 : i32
    %26 = tpu.dynamic_rotate %25 by %c1_i32_8 dim 0 : vector<16x32xf32>, i32 -> vector<16x32xf32>
    %c15_i32_9 = arith.constant 15 : i32
    %27 = tpu.dynamic_rotate %25 by %c15_i32_9 dim 0 : vector<16x32xf32>, i32 -> vector<16x32xf32>
    %c1 = arith.constant 1 : index
    %c0_10 = arith.constant 0 : index
    %c0_11 = arith.constant 0 : index
    %28 = vector.load %arg2[%c1, %c0_10, %c0_11] : memref<6x96x32xf32, #tpu.memory_space<vmem>>, vector<1x32x32xf32>
    %29 = vector.shape_cast %28 : vector<1x32x32xf32> to vector<32x32xf32>
    %cst_12 = arith.constant dense<0.000000e+00> : vector<16x32xf32>
    %30 = tpu.matmul %26, %29, %cst_12 {dimension_numbers = #tpu.dot_dimension_numbers<[1], [0], [0], [1], [0, 0, 1, 1], [], []>} : vector<16x32xf32>, vector<32x32xf32>, vector<16x32xf32> -> vector<16x32xf32>
    %c1_13 = arith.constant 1 : index
    %c32 = arith.constant 32 : index
    %c0_14 = arith.constant 0 : index
    %31 = vector.load %arg2[%c1_13, %c32, %c0_14] : memref<6x96x32xf32, #tpu.memory_space<vmem>>, vector<1x32x32xf32>
    %32 = vector.shape_cast %31 : vector<1x32x32xf32> to vector<32x32xf32>
    %cst_15 = arith.constant dense<0.000000e+00> : vector<16x32xf32>
    %33 = tpu.matmul %25, %32, %cst_15 {dimension_numbers = #tpu.dot_dimension_numbers<[1], [0], [0], [1], [0, 0, 1, 1], [], []>} : vector<16x32xf32>, vector<32x32xf32>, vector<16x32xf32> -> vector<16x32xf32>
    %34 = arith.addf %30, %33 : vector<16x32xf32>
    %c1_16 = arith.constant 1 : index
    %c64 = arith.constant 64 : index
    %c0_17 = arith.constant 0 : index
    %35 = vector.load %arg2[%c1_16, %c64, %c0_17] : memref<6x96x32xf32, #tpu.memory_space<vmem>>, vector<1x32x32xf32>
    %36 = vector.shape_cast %35 : vector<1x32x32xf32> to vector<32x32xf32>
    %cst_18 = arith.constant dense<0.000000e+00> : vector<16x32xf32>
    %37 = tpu.matmul %27, %36, %cst_18 {dimension_numbers = #tpu.dot_dimension_numbers<[1], [0], [0], [1], [0, 0, 1, 1], [], []>} : vector<16x32xf32>, vector<32x32xf32>, vector<16x32xf32> -> vector<16x32xf32>
    %38 = arith.addf %34, %37 : vector<16x32xf32>
    %c1_19 = arith.constant 1 : index
    %c0_20 = arith.constant 0 : index
    %c0_21 = arith.constant 0 : index
    %39 = vector.load %arg3[%c1_19, %c0_20, %c0_21] : memref<6x1x32xf32, #tpu.memory_space<vmem>>, vector<1x1x32xf32>
    %40 = vector.shape_cast %39 : vector<1x1x32xf32> to vector<1x32xf32>
    %41 = vector.broadcast %40 : vector<1x32xf32> to vector<16x32xf32>
    %42 = arith.addf %38, %41 : vector<16x32xf32>
    %cst_22 = arith.constant 0.000000e+00 : f32
    %43 = vector.broadcast %cst_22 : f32 to vector<16x32xf32>
    %44 = arith.maximumf %42, %43 : vector<16x32xf32>
    %c1_i32_23 = arith.constant 1 : i32
    %45 = tpu.dynamic_rotate %44 by %c1_i32_23 dim 0 : vector<16x32xf32>, i32 -> vector<16x32xf32>
    %c15_i32_24 = arith.constant 15 : i32
    %46 = tpu.dynamic_rotate %44 by %c15_i32_24 dim 0 : vector<16x32xf32>, i32 -> vector<16x32xf32>
    %c2 = arith.constant 2 : index
    %c0_25 = arith.constant 0 : index
    %c0_26 = arith.constant 0 : index
    %47 = vector.load %arg2[%c2, %c0_25, %c0_26] : memref<6x96x32xf32, #tpu.memory_space<vmem>>, vector<1x32x32xf32>
    %48 = vector.shape_cast %47 : vector<1x32x32xf32> to vector<32x32xf32>
    %cst_27 = arith.constant dense<0.000000e+00> : vector<16x32xf32>
    %49 = tpu.matmul %45, %48, %cst_27 {dimension_numbers = #tpu.dot_dimension_numbers<[1], [0], [0], [1], [0, 0, 1, 1], [], []>} : vector<16x32xf32>, vector<32x32xf32>, vector<16x32xf32> -> vector<16x32xf32>
    %c2_28 = arith.constant 2 : index
    %c32_29 = arith.constant 32 : index
    %c0_30 = arith.constant 0 : index
    %50 = vector.load %arg2[%c2_28, %c32_29, %c0_30] : memref<6x96x32xf32, #tpu.memory_space<vmem>>, vector<1x32x32xf32>
    %51 = vector.shape_cast %50 : vector<1x32x32xf32> to vector<32x32xf32>
    %cst_31 = arith.constant dense<0.000000e+00> : vector<16x32xf32>
    %52 = tpu.matmul %44, %51, %cst_31 {dimension_numbers = #tpu.dot_dimension_numbers<[1], [0], [0], [1], [0, 0, 1, 1], [], []>} : vector<16x32xf32>, vector<32x32xf32>, vector<16x32xf32> -> vector<16x32xf32>
    %53 = arith.addf %49, %52 : vector<16x32xf32>
    %c2_32 = arith.constant 2 : index
    %c64_33 = arith.constant 64 : index
    %c0_34 = arith.constant 0 : index
    %54 = vector.load %arg2[%c2_32, %c64_33, %c0_34] : memref<6x96x32xf32, #tpu.memory_space<vmem>>, vector<1x32x32xf32>
    %55 = vector.shape_cast %54 : vector<1x32x32xf32> to vector<32x32xf32>
    %cst_35 = arith.constant dense<0.000000e+00> : vector<16x32xf32>
    %56 = tpu.matmul %46, %55, %cst_35 {dimension_numbers = #tpu.dot_dimension_numbers<[1], [0], [0], [1], [0, 0, 1, 1], [], []>} : vector<16x32xf32>, vector<32x32xf32>, vector<16x32xf32> -> vector<16x32xf32>
    %57 = arith.addf %53, %56 : vector<16x32xf32>
    %c2_36 = arith.constant 2 : index
    %c0_37 = arith.constant 0 : index
    %c0_38 = arith.constant 0 : index
    %58 = vector.load %arg3[%c2_36, %c0_37, %c0_38] : memref<6x1x32xf32, #tpu.memory_space<vmem>>, vector<1x1x32xf32>
    %59 = vector.shape_cast %58 : vector<1x1x32xf32> to vector<1x32xf32>
    %60 = vector.broadcast %59 : vector<1x32xf32> to vector<16x32xf32>
    %61 = arith.addf %57, %60 : vector<16x32xf32>
    %cst_39 = arith.constant 0.000000e+00 : f32
    %62 = vector.broadcast %cst_39 : f32 to vector<16x32xf32>
    %63 = arith.maximumf %61, %62 : vector<16x32xf32>
    %c1_i32_40 = arith.constant 1 : i32
    %64 = tpu.dynamic_rotate %63 by %c1_i32_40 dim 0 : vector<16x32xf32>, i32 -> vector<16x32xf32>
    %c15_i32_41 = arith.constant 15 : i32
    %65 = tpu.dynamic_rotate %63 by %c15_i32_41 dim 0 : vector<16x32xf32>, i32 -> vector<16x32xf32>
    %c3 = arith.constant 3 : index
    %c0_42 = arith.constant 0 : index
    %c0_43 = arith.constant 0 : index
    %66 = vector.load %arg2[%c3, %c0_42, %c0_43] : memref<6x96x32xf32, #tpu.memory_space<vmem>>, vector<1x32x32xf32>
    %67 = vector.shape_cast %66 : vector<1x32x32xf32> to vector<32x32xf32>
    %cst_44 = arith.constant dense<0.000000e+00> : vector<16x32xf32>
    %68 = tpu.matmul %64, %67, %cst_44 {dimension_numbers = #tpu.dot_dimension_numbers<[1], [0], [0], [1], [0, 0, 1, 1], [], []>} : vector<16x32xf32>, vector<32x32xf32>, vector<16x32xf32> -> vector<16x32xf32>
    %c3_45 = arith.constant 3 : index
    %c32_46 = arith.constant 32 : index
    %c0_47 = arith.constant 0 : index
    %69 = vector.load %arg2[%c3_45, %c32_46, %c0_47] : memref<6x96x32xf32, #tpu.memory_space<vmem>>, vector<1x32x32xf32>
    %70 = vector.shape_cast %69 : vector<1x32x32xf32> to vector<32x32xf32>
    %cst_48 = arith.constant dense<0.000000e+00> : vector<16x32xf32>
    %71 = tpu.matmul %63, %70, %cst_48 {dimension_numbers = #tpu.dot_dimension_numbers<[1], [0], [0], [1], [0, 0, 1, 1], [], []>} : vector<16x32xf32>, vector<32x32xf32>, vector<16x32xf32> -> vector<16x32xf32>
    %72 = arith.addf %68, %71 : vector<16x32xf32>
    %c3_49 = arith.constant 3 : index
    %c64_50 = arith.constant 64 : index
    %c0_51 = arith.constant 0 : index
    %73 = vector.load %arg2[%c3_49, %c64_50, %c0_51] : memref<6x96x32xf32, #tpu.memory_space<vmem>>, vector<1x32x32xf32>
    %74 = vector.shape_cast %73 : vector<1x32x32xf32> to vector<32x32xf32>
    %cst_52 = arith.constant dense<0.000000e+00> : vector<16x32xf32>
    %75 = tpu.matmul %65, %74, %cst_52 {dimension_numbers = #tpu.dot_dimension_numbers<[1], [0], [0], [1], [0, 0, 1, 1], [], []>} : vector<16x32xf32>, vector<32x32xf32>, vector<16x32xf32> -> vector<16x32xf32>
    %76 = arith.addf %72, %75 : vector<16x32xf32>
    %c3_53 = arith.constant 3 : index
    %c0_54 = arith.constant 0 : index
    %c0_55 = arith.constant 0 : index
    %77 = vector.load %arg3[%c3_53, %c0_54, %c0_55] : memref<6x1x32xf32, #tpu.memory_space<vmem>>, vector<1x1x32xf32>
    %78 = vector.shape_cast %77 : vector<1x1x32xf32> to vector<1x32xf32>
    %79 = vector.broadcast %78 : vector<1x32xf32> to vector<16x32xf32>
    %80 = arith.addf %76, %79 : vector<16x32xf32>
    %cst_56 = arith.constant 0.000000e+00 : f32
    %81 = vector.broadcast %cst_56 : f32 to vector<16x32xf32>
    %82 = arith.maximumf %80, %81 : vector<16x32xf32>
    %c1_i32_57 = arith.constant 1 : i32
    %83 = tpu.dynamic_rotate %82 by %c1_i32_57 dim 0 : vector<16x32xf32>, i32 -> vector<16x32xf32>
    %c15_i32_58 = arith.constant 15 : i32
    %84 = tpu.dynamic_rotate %82 by %c15_i32_58 dim 0 : vector<16x32xf32>, i32 -> vector<16x32xf32>
    %c4 = arith.constant 4 : index
    %c0_59 = arith.constant 0 : index
    %c0_60 = arith.constant 0 : index
    %85 = vector.load %arg2[%c4, %c0_59, %c0_60] : memref<6x96x32xf32, #tpu.memory_space<vmem>>, vector<1x32x32xf32>
    %86 = vector.shape_cast %85 : vector<1x32x32xf32> to vector<32x32xf32>
    %cst_61 = arith.constant dense<0.000000e+00> : vector<16x32xf32>
    %87 = tpu.matmul %83, %86, %cst_61 {dimension_numbers = #tpu.dot_dimension_numbers<[1], [0], [0], [1], [0, 0, 1, 1], [], []>} : vector<16x32xf32>, vector<32x32xf32>, vector<16x32xf32> -> vector<16x32xf32>
    %c4_62 = arith.constant 4 : index
    %c32_63 = arith.constant 32 : index
    %c0_64 = arith.constant 0 : index
    %88 = vector.load %arg2[%c4_62, %c32_63, %c0_64] : memref<6x96x32xf32, #tpu.memory_space<vmem>>, vector<1x32x32xf32>
    %89 = vector.shape_cast %88 : vector<1x32x32xf32> to vector<32x32xf32>
    %cst_65 = arith.constant dense<0.000000e+00> : vector<16x32xf32>
    %90 = tpu.matmul %82, %89, %cst_65 {dimension_numbers = #tpu.dot_dimension_numbers<[1], [0], [0], [1], [0, 0, 1, 1], [], []>} : vector<16x32xf32>, vector<32x32xf32>, vector<16x32xf32> -> vector<16x32xf32>
    %91 = arith.addf %87, %90 : vector<16x32xf32>
    %c4_66 = arith.constant 4 : index
    %c64_67 = arith.constant 64 : index
    %c0_68 = arith.constant 0 : index
    %92 = vector.load %arg2[%c4_66, %c64_67, %c0_68] : memref<6x96x32xf32, #tpu.memory_space<vmem>>, vector<1x32x32xf32>
    %93 = vector.shape_cast %92 : vector<1x32x32xf32> to vector<32x32xf32>
    %cst_69 = arith.constant dense<0.000000e+00> : vector<16x32xf32>
    %94 = tpu.matmul %84, %93, %cst_69 {dimension_numbers = #tpu.dot_dimension_numbers<[1], [0], [0], [1], [0, 0, 1, 1], [], []>} : vector<16x32xf32>, vector<32x32xf32>, vector<16x32xf32> -> vector<16x32xf32>
    %95 = arith.addf %91, %94 : vector<16x32xf32>
    %c4_70 = arith.constant 4 : index
    %c0_71 = arith.constant 0 : index
    %c0_72 = arith.constant 0 : index
    %96 = vector.load %arg3[%c4_70, %c0_71, %c0_72] : memref<6x1x32xf32, #tpu.memory_space<vmem>>, vector<1x1x32xf32>
    %97 = vector.shape_cast %96 : vector<1x1x32xf32> to vector<1x32xf32>
    %98 = vector.broadcast %97 : vector<1x32xf32> to vector<16x32xf32>
    %99 = arith.addf %95, %98 : vector<16x32xf32>
    %cst_73 = arith.constant 0.000000e+00 : f32
    %100 = vector.broadcast %cst_73 : f32 to vector<16x32xf32>
    %101 = arith.maximumf %99, %100 : vector<16x32xf32>
    %c1_i32_74 = arith.constant 1 : i32
    %102 = tpu.dynamic_rotate %101 by %c1_i32_74 dim 0 : vector<16x32xf32>, i32 -> vector<16x32xf32>
    %c15_i32_75 = arith.constant 15 : i32
    %103 = tpu.dynamic_rotate %101 by %c15_i32_75 dim 0 : vector<16x32xf32>, i32 -> vector<16x32xf32>
    %c5 = arith.constant 5 : index
    %c0_76 = arith.constant 0 : index
    %c0_77 = arith.constant 0 : index
    %104 = vector.load %arg2[%c5, %c0_76, %c0_77] : memref<6x96x32xf32, #tpu.memory_space<vmem>>, vector<1x32x32xf32>
    %105 = vector.shape_cast %104 : vector<1x32x32xf32> to vector<32x32xf32>
    %cst_78 = arith.constant dense<0.000000e+00> : vector<16x32xf32>
    %106 = tpu.matmul %102, %105, %cst_78 {dimension_numbers = #tpu.dot_dimension_numbers<[1], [0], [0], [1], [0, 0, 1, 1], [], []>} : vector<16x32xf32>, vector<32x32xf32>, vector<16x32xf32> -> vector<16x32xf32>
    %c5_79 = arith.constant 5 : index
    %c32_80 = arith.constant 32 : index
    %c0_81 = arith.constant 0 : index
    %107 = vector.load %arg2[%c5_79, %c32_80, %c0_81] : memref<6x96x32xf32, #tpu.memory_space<vmem>>, vector<1x32x32xf32>
    %108 = vector.shape_cast %107 : vector<1x32x32xf32> to vector<32x32xf32>
    %cst_82 = arith.constant dense<0.000000e+00> : vector<16x32xf32>
    %109 = tpu.matmul %101, %108, %cst_82 {dimension_numbers = #tpu.dot_dimension_numbers<[1], [0], [0], [1], [0, 0, 1, 1], [], []>} : vector<16x32xf32>, vector<32x32xf32>, vector<16x32xf32> -> vector<16x32xf32>
    %110 = arith.addf %106, %109 : vector<16x32xf32>
    %c5_83 = arith.constant 5 : index
    %c64_84 = arith.constant 64 : index
    %c0_85 = arith.constant 0 : index
    %111 = vector.load %arg2[%c5_83, %c64_84, %c0_85] : memref<6x96x32xf32, #tpu.memory_space<vmem>>, vector<1x32x32xf32>
    %112 = vector.shape_cast %111 : vector<1x32x32xf32> to vector<32x32xf32>
    %cst_86 = arith.constant dense<0.000000e+00> : vector<16x32xf32>
    %113 = tpu.matmul %103, %112, %cst_86 {dimension_numbers = #tpu.dot_dimension_numbers<[1], [0], [0], [1], [0, 0, 1, 1], [], []>} : vector<16x32xf32>, vector<32x32xf32>, vector<16x32xf32> -> vector<16x32xf32>
    %114 = arith.addf %110, %113 : vector<16x32xf32>
    %c5_87 = arith.constant 5 : index
    %c0_88 = arith.constant 0 : index
    %c0_89 = arith.constant 0 : index
    %115 = vector.load %arg3[%c5_87, %c0_88, %c0_89] : memref<6x1x32xf32, #tpu.memory_space<vmem>>, vector<1x1x32xf32>
    %116 = vector.shape_cast %115 : vector<1x1x32xf32> to vector<1x32xf32>
    %117 = vector.broadcast %116 : vector<1x32xf32> to vector<16x32xf32>
    %118 = arith.addf %114, %117 : vector<16x32xf32>
    %c0_90 = arith.constant 0 : index
    %c0_91 = arith.constant 0 : index
    %c0_92 = arith.constant 0 : index
    %119 = vector.load %arg4[%c0_90, %c0_91, %c0_92] : memref<1x16x32xf32, #tpu.memory_space<vmem>>, vector<1x16x32xf32>
    %120 = vector.shape_cast %119 : vector<1x16x32xf32> to vector<16x32xf32>
    %121 = vector.shape_cast %118 : vector<16x32xf32> to vector<1x16x32xf32>
    tpu.vector_store %arg4[%c0_90, %c0_91, %c0_92], %121 {strides = array<i32>} : memref<1x16x32xf32, #tpu.memory_space<vmem>>, vector<1x16x32xf32>,
    return
  }
  func.func @transform_0(%arg0: i32) -> (i32, i32, i32) {
    %c0_i32 = arith.constant 0 : i32
    %c0_i32_0 = arith.constant 0 : i32
    %c0_i32_1 = arith.constant 0 : i32
    return %arg0, %c0_i32, %c0_i32_0 : i32, i32, i32
  }
  func.func @transform_1(%arg0: i32) -> (i32, i32, i32) {
    %c0_i32 = arith.constant 0 : i32
    %c0_i32_0 = arith.constant 0 : i32
    %c0_i32_1 = arith.constant 0 : i32
    %c0_i32_2 = arith.constant 0 : i32
    return %c0_i32, %c0_i32_0, %c0_i32_1 : i32, i32, i32
  }
  func.func @transform_2(%arg0: i32) -> (i32, i32, i32) {
    %c0_i32 = arith.constant 0 : i32
    %c0_i32_0 = arith.constant 0 : i32
    %c0_i32_1 = arith.constant 0 : i32
    %c0_i32_2 = arith.constant 0 : i32
    return %c0_i32, %c0_i32_0, %c0_i32_1 : i32, i32, i32
  }
  func.func @transform_3(%arg0: i32) -> (i32, i32, i32) {
    %c0_i32 = arith.constant 0 : i32
    %c0_i32_0 = arith.constant 0 : i32
    %c0_i32_1 = arith.constant 0 : i32
    return %arg0, %c0_i32, %c0_i32_0 : i32, i32, i32
  }
}

</mosaic_0001>

<bundles_post_ra>
// kernel: cnn_forward.1
= control target key start
LH: loop header
LB: loop body
LE: loop exit
PB: predicated region body
PF: predicated region fallthrough
CT: control target
= control target key end

     0   :  { %s2244_s12 = smov 0   ;;  %s2556_s0 = inlined_call_operand.vmem [shape: f32[2,16,1], index: 0, kind: input, shape index: {}]   ;;  %s2557_s1 = inlined_call_operand.vmem [shape: f32[6,96,32], index: 1, kind: input, shape index: {}]   ;;  %s2558_s2 = inlined_call_operand.vmem [shape: f32[6,1,32], index: 2, kind: input, shape index: {}]   ;;  %s2559_s3 = inlined_call_operand.vmem [shape: f32[2,16,32], index: 3, kind: output, shape index: {}]  }
   0x1 LB: > { %s1695_s13 = sadd.s32 4294967295, %s2221_s12   ;;  %p1699_p0 = scmp.ge.s32.totalorder %s2221_s12, 1  ;;  %s2221_s12 = sphi %s2244_s12, %s13_s12  }
   0x2   : > { %p137_p1 = scmp.lt.s32.totalorder %s2221_s12, 3 }
   0x4   : > { %p138_p2 = pnand %p1699_p0, %p137_p1 }
   0x5   : > { %p161_p3 = scmp.lt.s32.totalorder (!%p138_p2), %s1695_s13, 1  ;;  %v175_v0 = vlaneseq (!%p138_p2)  ;;  %v2223_v1 = vmov (!%p138_p2), 0   ;;  %v1709_v13 = vld [vmem:[%s2557_s1 + $0x80] sm:$0xff] (!%p138_p2)  ;;  %v1710_v14 = vld [vmem:[%s2557_s1 + $0x88] sm:$0xff] (!%p138_p2)  ;;  %v1711_v19 = vld [vmem:[%s2557_s1 + $0x90] sm:$0xff] (!%p138_p2)  ;;  %vm266_vm2 = vcmask (!%p138_p2), 261120  }
   0x6   : > { %141 = sbr.rel (%p138_p2) target bundleno = 1330 (0x532), region = 32  ;;  %2213 = vset.pattern.permute.xlu1 (!%p138_p2), %v2223_v1  ;;  %2214 = vset.pattern.permute.xlu0 (!%p138_p2), %v2223_v1  ;;  %v2064_v15 = vpack.c.bf16 (!%p138_p2), %v1710_v14, %v1709_v13  ;;  %v1705_v16 = vld [vmem:[%s2557_s1 + $0x60] sm:$0xff] (!%p138_p2)  ;;  %v1706_v17 = vld [vmem:[%s2557_s1 + $0x68] sm:$0xff] (!%p138_p2)  ;;  %v1712_v20 = vld [vmem:[%s2557_s1 + $0x98] sm:$0xff] (!%p138_p2) }
   0x7   : > { %v2254_v2 = vshrl.u32 (!%p138_p2), %v175_v0, 7  ;;  %v2072_v18 = vpack.c.bf16 (!%p138_p2), %v1706_v17, %v1705_v16  ;;  %v2068_v21 = vpack.c.bf16 (!%p138_p2), %v1712_v20, %v1711_v19  ;;  %v1707_v22 = vld [vmem:[%s2557_s1 + $0x70] sm:$0xff] (!%p138_p2)  ;;  %v1708_v23 = vld [vmem:[%s2557_s1 + $0x78] sm:$0xff] (!%p138_p2)  ;;  %v1717_v25 = vld [vmem:[%s2557_s1 + $0xa0] sm:$0xff] (!%p138_p2) }
   0x8   : > { %2065 = vmatprep.subr.bf16.mxu1 (!%p138_p2), %v2064_v15  ;;  %v2076_v24 = vpack.c.bf16 (!%p138_p2), %v1708_v23, %v1707_v22  ;;  %v1718_v26 = vld [vmem:[%s2557_s1 + $0xa8] sm:$0xff] (!%p138_p2)  ;;  %v185_v31 = vld [vmem:[%s2557_s1] sm:$0x7] (!%p138_p2)  ;;  %v1719_v56 = vld [vmem:[%s2557_s1 + $0xb0] sm:$0xff] (!%p138_p2) }
   0x9   : > { %vm177_vm0 = vcmp.lt.s32.totalorder (!%p138_p2), %v2254_v2, 1  ;;  %vm182_vm1 = vcmp.lt.s32.totalorder (!%p138_p2), %v2254_v2, 7  ;;  %2067 = vmatpush3.bf16.msra.mxu1 (!%p138_p2), %v2064_v15  ;;  %2073 = vmatprep.subr.bf16.mxu0 (!%p138_p2), %v2072_v18  ;;  %v2080_v27 = vpack.c.bf16 (!%p138_p2), %v1718_v26, %v1717_v25  ;;  %v214_v28 = vsub.s32 (!%p138_p2), 1, %v2254_v2  ;;  %v1704_v46 = vld [vmem:[%s2558_s2] ss:$0 sm:$0xff] (!%p138_p2)  ;;  %v1720_v57 = vld [vmem:[%s2557_s1 + $0xb8] sm:$0xff] (!%p138_p2) }
   0xa   : > { %2075 = vmatpush3.bf16.msra.mxu0 (!%p138_p2), %v2072_v18  ;;  %2069 = vmatprep.subr.bf16.mxu1 (!%p138_p2), %v2068_v21  ;;  %v198_v30 = vsub.s32 (!%p138_p2), 0, %v2254_v2  ;;  %v232_v32 = vsub.s32 (!%p138_p2), 2, %v2254_v2  ;;  %v2084_v0 = vpack.c.bf16 (!%p138_p2), %v1720_v57, %v1719_v56  ;;  %v1749_v13 = vld [vmem:[%s2557_s1 + $0x140] sm:$0xff] (!%p138_p2)  ;;  %v1750_v14 = vld [vmem:[%s2557_s1 + $0x148] sm:$0xff] (!%p138_p2)  ;;  %v1727_v25 = vld [vmem:[%s2557_s1 + $0xd0] sm:$0xff] (!%p138_p2) }
   0xb   : > { %2077 = vmatprep.subr.bf16.mxu0 (!%p138_p2), %v2076_v24  ;;  %v215_v34 = vrot.slane (!%p138_p2), %v185_v31, %v214_v28  ;;  %v2112_v15 = vpack.c.bf16 (!%p138_p2), %v1750_v14, %v1749_v13  ;;  %v1724_v19 = vld [vmem:[%s2558_s2 + $0x1] ss:$0 sm:$0xff] (!%p138_p2)  ;;  %v1728_v26 = vld [vmem:[%s2557_s1 + $0xd8] sm:$0xff] (!%p138_p2)  ;;  %v1771_v14 = vld [vmem:[%s2557_s1 + $0x1b0] sm:$0xff] (!%p138_p2) }
   0xc   : > { %v199_v35 = vrot.slane (!%p138_p2), %v185_v31, %v198_v30  ;;  %v233_v37 = vrot.slane (!%p138_p2), %v185_v31, %v232_v32  ;;  %v2100_v31 = vpack.c.bf16 (!%p138_p2), %v1728_v26, %v1727_v25  ;;  %v1804_v2 = vld [vmem:[%s2558_s2 + $0x5] ss:$0 sm:$0xff] (!%p138_p2) }
   0xd   : > { %s2561_s13 = smov (!%p161_p3, %s1695_s13), 1  ;;  %2071 = vmatpush3.bf16.msra.mxu1 %v2068_v21 }
   0xe   : > { %s1807_s14 = sshll.u32 %s2561_s13, 4  ;;  %2079 = vmatpush3.bf16.msra.mxu0 %v2076_v24 }
   0xf   : > { %s165_s17 = scalar_lea.vmem %s2556_s0, %s1807_s14  ;;  %2081 = vmatprep.subr.bf16.mxu0 %v2080_v27  ;;  %s170_s7 = scalar_lea.vmem %s2559_s3, %s1807_s14 }
  0x10   : > { %v171_v3 = vld [vmem:[%s165_s17] sm:$0xff]  ;;  %v172_v4 = vld [vmem:[%s165_s17 + $0x8] sm:$0xff] }
  0x11   : > { %204 = vperm.xlu1 %2213, %v171_v3   ;;  %v173_v5 = vrot.slane %v171_v3, 7  ;;  %v174_v6 = vrot.slane %v172_v4, 7  ;;  %v181_v7 = vrot.slane %v172_v4, 1  ;;  %v180_v8 = vrot.slane %v171_v3, 1 }
  0x13   : > { %v179_v9 = vsel %vm177_vm0, %v174_v6, %v173_v5  ;;  %v178_v10 = vsel %vm177_vm0, %v173_v5, %v174_v6  ;;  %v184_v11 = vsel %vm182_vm1, %v181_v7, %v180_v8  ;;  %v183_v12 = vsel %vm182_vm1, %v180_v8, %v181_v7  ;;  %v1730_v5 = vld [vmem:[%s2557_s1 + $0xe8] sm:$0xff]  ;;  %v1731_v7 = vld [vmem:[%s2557_s1 + $0xf0] sm:$0xff]  ;;  %v1732_v8 = vld [vmem:[%s2557_s1 + $0xf8] sm:$0xff] }
  0x14   : > { %188 = vperm.xlu0 %2214, %v179_v9   ;;  %v2092_v9 = vpack.c.bf16 %v1732_v8, %v1731_v7 }
  0x15   : > { %209 = vperm.xlu1 %2213, %v172_v4   ;;  %v1729_v4 = vld [vmem:[%s2557_s1 + $0xe0] sm:$0xff] }
  0x16   : > { %v2088_v6 = vpack.c.bf16 %v1730_v5, %v1729_v4  ;;  %v1757_v4 = vld [vmem:[%s2557_s1 + $0x160] sm:$0xff]  ;;  %v1758_v5 = vld [vmem:[%s2557_s1 + $0x168] sm:$0xff] }
  0x18   : > { %193 = vperm.xlu0 %2214, %v178_v10   ;;  %2089 = vmatprep.subr.bf16.mxu1 %v2088_v6  ;;  %v1725_v10 = vld [vmem:[%s2557_s1 + $0xc0] sm:$0xff] }
  0x19   : > { %227 = vperm.xlu1 %2213, %v184_v11   ;;  %v1726_v11 = vld [vmem:[%s2557_s1 + $0xc8] sm:$0xff] }
  0x1c   : > { %222 = vperm.xlu0 %2214, %v183_v12   ;;  %v2096_v12 = vpack.c.bf16 %v1726_v11, %v1725_v10  ;;  %v2128_v10 = vpack.c.bf16 %v1758_v5, %v1757_v4  ;;  %v1759_v11 = vld [vmem:[%s2557_s1 + $0x170] sm:$0xff]  ;;  %v1797_v4 = vld [vmem:[%s2557_s1 + $0x220] sm:$0xff]  ;;  %v1798_v5 = vld [vmem:[%s2557_s1 + $0x228] sm:$0xff] }
  0x90   : > { %v205_v29 = vpop.permute.xlu1 %204 }
  0x91   : > { %v216_v39 = vmul.f32 %v215_v34, %v205_v29 }
  0x93   : > { %v189_v33 = vpop.permute.xlu0 %188 }
  0x94   : > { %v210_v36 = vpop.permute.xlu1 %209  ;;  %v200_v40 = vmul.f32 %v199_v35, %v189_v33 }
  0x95   : > { %v217_v41 = vmul.f32 %v215_v34, %v210_v36  ;;  %v1737_v34 = vld [vmem:[%s2557_s1 + $0x100] sm:$0xff] }
  0x96   : > { %v218_v48 = vadd.f32 %v216_v39, %v200_v40 }
  0x97   : > { %v194_v38 = vpop.permute.xlu0 %193 }
  0x98   : > { %v201_v42 = vmul.f32 %v199_v35, %v194_v38  ;;  %v228_v43 = vpop.permute.xlu1 %227  ;;  %v1738_v35 = vld [vmem:[%s2557_s1 + $0x108] sm:$0xff] }
  0x99   : > { %v235_v44 = vmul.f32 %v233_v37, %v228_v43  ;;  %v2104_v40 = vpack.c.bf16 %v1738_v35, %v1737_v34 }
  0x9a   : > { %v219_v45 = vadd.f32 %v217_v41, %v201_v42  ;;  %v1739_v41 = vld [vmem:[%s2557_s1 + $0x110] sm:$0xff]  ;;  %v1740_v42 = vld [vmem:[%s2557_s1 + $0x118] sm:$0xff] }
  0x9b   : > { %v223_v47 = vpop.permute.xlu0 %222  ;;  %v2108_v43 = vpack.c.bf16 %v1740_v42, %v1739_v41 }
  0x9c   : > { %v237_v49 = vadd.f32 %v235_v44, %v219_v45  ;;  %v234_v50 = vmul.f32 %v233_v37, %v223_v47  ;;  %v1751_v44 = vld [vmem:[%s2557_s1 + $0x150] sm:$0xff]  ;;  %v1752_v45 = vld [vmem:[%s2557_s1 + $0x158] sm:$0xff]  ;;  %v1745_v47 = vld [vmem:[%s2557_s1 + $0x120] sm:$0xff] }
  0x9e   : > { %v246_v51 = vadd.f32 %v1704_v46, %v237_v49  ;;  %v236_v52 = vadd.f32 %v234_v50, %v218_v48  ;;  %v1746_v48 = vld [vmem:[%s2557_s1 + $0x128] sm:$0xff]  ;;  %v1769_v50 = vld [vmem:[%s2557_s1 + $0x1a0] sm:$0xff] }
  0x9f   : > { %v2120_v49 = vpack.c.bf16 %v1746_v48, %v1745_v47  ;;  %v1791_v47 = vld [vmem:[%s2557_s1 + $0x210] sm:$0xff]  ;;  %v1792_v48 = vld [vmem:[%s2557_s1 + $0x218] sm:$0xff] }
  0xa0   : > { %v248_v53 = vmax.f32 %v246_v51, 0.0  ;;  %v245_v54 = vadd.f32 %v1704_v46, %v236_v52  ;;  %v2116_v46 = vpack.c.bf16 %v1752_v45, %v1751_v44  ;;  %v1770_v51 = vld [vmem:[%s2557_s1 + $0x1a8] sm:$0xff]  ;;  %v1779_v44 = vld [vmem:[%s2557_s1 + $0x1d0] sm:$0xff]  ;;  %v1780_v45 = vld [vmem:[%s2557_s1 + $0x1d8] sm:$0xff] }
  0xa1   : > { %v2136_v52 = vpack.c.bf16 %v1770_v51, %v1769_v50  ;;  %v1785_v50 = vld [vmem:[%s2557_s1 + $0x1e0] sm:$0xff]  ;;  %v1786_v51 = vld [vmem:[%s2557_s1 + $0x1e8] sm:$0xff] }
  0xa2   : > { %v247_v55 = vmax.f32 %v245_v54, 0.0  ;;  %v250_v59 = vrot.slane %v248_v53, 7  ;;  %v254_v63 = vrot.slane %v248_v53, 1 }
  0xa4   : > { %1907 = vmatprep.mubr.msk.f32.mxu1 %vm266_vm2, %v247_v55  ;;  %v249_v58 = vrot.slane %v247_v55, 7  ;;  %v253_v60 = vrot.slane %v247_v55, 1 }
  0xa5   : > { %1908 = vmatmul.mubr.msk.f32.vlgmr.msra.gmra.mrb[0].mxu1 %vm266_vm2, %v248_v53  ;;  %v1744_v53 = vld [vmem:[%s2558_s2 + $0x2] ss:$0 sm:$0xff] }
  0xa6   : > { %v252_v61 = vsel %vm177_vm0, %v250_v59, %v249_v58  ;;  %v251_v62 = vsel %vm177_vm0, %v249_v58, %v250_v59  ;;  %v255_v1 = vsel %vm182_vm1, %v253_v60, %v254_v63  ;;  %v256_v3 = vsel %vm182_vm1, %v254_v63, %v253_v60  ;;  %2091 = vmatpush3.bf16.msra.mxu1 %v2088_v6  ;;  %v1747_v58 = vld [vmem:[%s2557_s1 + $0x130] sm:$0xff]  ;;  %v1748_v59 = vld [vmem:[%s2557_s1 + $0x138] sm:$0xff] }
  0xa7   : > { %1918 = vmatprep.mubr.msk.f32.mxu0 %vm266_vm2, %v252_v61  ;;  %2093 = vmatprep.subr.bf16.mxu1 %v2092_v9 }
  0xa8   : > { %1919 = vmatmul.mubr.msk.f32.vlgmr.msra.gmra.mrb[0].mxu0 %vm266_vm2, %v251_v62 }
  0xa9   : > { %2083 = vmatpush3.bf16.msra.mxu0 %v2080_v27  ;;  %1929 = vmatprep.mubr.msk.f32.mxu0 %vm266_vm2, %v255_v1 }
  0xaa   : > { %2085 = vmatprep.subr.bf16.mxu0 %v2084_v0  ;;  %2095 = vmatpush3.bf16.msra.mxu1 %v2092_v9 }
  0xab   : > { %2097 = vmatprep.subr.bf16.mxu1 %v2096_v12 }
  0xad   : > { %2087 = vmatpush3.bf16.msra.mxu0 %v2084_v0  ;;  %v2124_v0 = vpack.c.bf16 %v1748_v59, %v1747_v58  ;;  %v1787_v58 = vld [vmem:[%s2557_s1 + $0x1f0] sm:$0xff]  ;;  %v1788_v59 = vld [vmem:[%s2557_s1 + $0x1f8] sm:$0xff] }
  0xae   : > { %2113 = vmatprep.subr.bf16.mxu0 %v2112_v15 }
  0xb0   : > { %1930 = vmatmul.mubr.msk.f32.vlgmr.msra.gmra.mrb[0].mxu0 %vm266_vm2, %v256_v3 }
  0xb1   : > { %2115 = vmatpush3.bf16.msra.mxu0 %v2112_v15  ;;  %v1772_v15 = vld [vmem:[%s2557_s1 + $0x1b8] sm:$0xff] }
  0xb2   : > { %2117 = vmatprep.subr.bf16.mxu0 %v2116_v46 }
  0xb5   : > { %2119 = vmatpush3.bf16.msra.mxu0 %v2116_v46  ;;  %v2156_v46 = vpack.c.bf16 %v1780_v45, %v1779_v44 }
  0xb6   : > { %2121 = vmatprep.subr.bf16.mxu0 %v2120_v49 }
 0x178   : > { %v1909_v16 = vpop.f32.mrb[0].mxu1 }
 0x179   : > { %v339_v17 = vpop.f32.mrb[1].mxu1 }
 0x183   : > { %v1931_v18 = vpop.f32.mrb[0].mxu0 }
 0x184   : > { %v2184_v20 = vadd.f32 %v1931_v18, %v1909_v16  ;;  %v505_v21 = vpop.f32.mrb[1].mxu0  ;;  %v2140_v16 = vpack.c.bf16 %v1772_v15, %v1771_v14  ;;  %v1766_v18 = vld [vmem:[%s2557_s1 + $0x188] sm:$0xff] }
 0x185   : > { %v2185_v22 = vadd.f32 %v505_v21, %v339_v17  ;;  %v1765_v17 = vld [vmem:[%s2557_s1 + $0x180] sm:$0xff]  ;;  %v1790_v21 = vld [vmem:[%s2557_s1 + $0x208] sm:$0xff] }
 0x186   : > { %v525_v23 = vadd.f32 %v2184_v20, %v1724_v19  ;;  %v1789_v20 = vld [vmem:[%s2557_s1 + $0x200] sm:$0xff] }
 0x187   : > { %v524_v24 = vadd.f32 %v2185_v22, %v1724_v19  ;;  %v2144_v19 = vpack.c.bf16 %v1766_v18, %v1765_v17  ;;  %v2160_v22 = vpack.c.bf16 %v1790_v21, %v1789_v20 }
 0x188   : > { %v527_v27 = vmax.f32 %v525_v23, 0.0  ;;  %v1764_v23 = vld [vmem:[%s2558_s2 + $0x3] ss:$0 sm:$0xff] }
 0x189   : > { %v526_v28 = vmax.f32 %v524_v24, 0.0 }
 0x18a   : > { %v529_v29 = vrot.slane %v527_v27, 7  ;;  %v533_v30 = vrot.slane %v527_v27, 1 }
 0x18b   : > { %v528_v32 = vrot.slane %v526_v28, 7  ;;  %v532_v33 = vrot.slane %v526_v28, 1  ;;  %1940 = vmatprep.mubr.msk.f32.mxu1 %vm266_vm2, %v526_v28  ;;  %v1767_v28 = vld [vmem:[%s2557_s1 + $0x190] sm:$0xff] }
 0x18c   : > { %1941 = vmatmul.mubr.msk.f32.vlgmr.msra.gmra.mrb[2].mxu1 %vm266_vm2, %v527_v27 }
 0x18d   : > { %2099 = vmatpush3.bf16.msra.mxu1 %v2096_v12  ;;  %v531_v36 = vsel %vm177_vm0, %v529_v29, %v528_v32  ;;  %v530_v37 = vsel %vm177_vm0, %v528_v32, %v529_v29  ;;  %v534_v38 = vsel %vm182_vm1, %v532_v33, %v533_v30  ;;  %v535_v39 = vsel %vm182_vm1, %v533_v30, %v532_v33  ;;  %v1760_v12 = vld [vmem:[%s2557_s1 + $0x178] sm:$0xff] }
 0x18e   : > { %1951 = vmatprep.mubr.msk.f32.mxu1 %vm266_vm2, %v531_v36  ;;  %2101 = vmatprep.subr.bf16.mxu1 %v2100_v31  ;;  %v2132_v13 = vpack.c.bf16 %v1760_v12, %v1759_v11  ;;  %v1768_v29 = vld [vmem:[%s2557_s1 + $0x198] sm:$0xff]  ;;  %v1799_v11 = vld [vmem:[%s2557_s1 + $0x230] sm:$0xff] }
 0x18f   : > { %v2148_v34 = vpack.c.bf16 %v1768_v29, %v1767_v28  ;;  %v1800_v12 = vld [vmem:[%s2557_s1 + $0x238] sm:$0xff] }
 0x191   : > { %2103 = vmatpush3.bf16.msra.mxu1 %v2100_v31 }
 0x192   : > { %2105 = vmatprep.subr.bf16.mxu1 %v2104_v40 }
 0x194   : > { %1952 = vmatmul.mubr.msk.f32.vlgmr.msra.gmra.mrb[2].mxu1 %vm266_vm2, %v530_v37  ;;  %v1777_v37 = vld [vmem:[%s2557_s1 + $0x1c0] sm:$0xff] }
 0x195   : > { %2107 = vmatpush3.bf16.msra.mxu1 %v2104_v40  ;;  %1962 = vmatprep.mubr.msk.f32.mxu1 %vm266_vm2, %v534_v38  ;;  %v1778_v38 = vld [vmem:[%s2557_s1 + $0x1c8] sm:$0xff] }
 0x196   : > { %2109 = vmatprep.subr.bf16.mxu1 %v2108_v43 }
 0x199   : > { %2111 = vmatpush3.bf16.msra.mxu1 %v2108_v43  ;;  %v2152_v43 = vpack.c.bf16 %v1778_v38, %v1777_v37 }
 0x19a   : > { %2137 = vmatprep.subr.bf16.mxu1 %v2136_v52 }
 0x19c   : > { %1963 = vmatmul.mubr.msk.f32.vlgmr.msra.gmra.mrb[2].mxu1 %vm266_vm2, %v535_v39 }
 0x19d   : > { %2139 = vmatpush3.bf16.msra.mxu1 %v2136_v52  ;;  %v2168_v52 = vpack.c.bf16 %v1786_v51, %v1785_v50 }
 0x19e   : > { %2141 = vmatprep.subr.bf16.mxu1 %v2140_v16 }
 0x1a1   : > { %2143 = vmatpush3.bf16.msra.mxu1 %v2140_v16 }
 0x1a2   : > { %2145 = vmatprep.subr.bf16.mxu1 %v2144_v19 }
 0x26f   : > { %v1964_v54 = vpop.f32.mrb[2].mxu1 }
 0x270   : > { %v803_v55 = vadd.f32 %v1964_v54, %v1744_v53  ;;  %v783_v56 = vpop.f32.mrb[3].mxu1 }
 0x271   : > { %v802_v57 = vadd.f32 %v1744_v53, %v783_v56  ;;  %v1784_v53 = vld [vmem:[%s2558_s2 + $0x4] ss:$0 sm:$0xff] }
 0x272   : > { %v805_v60 = vmax.f32 %v803_v55, 0.0 }
 0x273   : > { %v804_v61 = vmax.f32 %v802_v57, 0.0 }
 0x274   : > { %v807_v62 = vrot.slane %v805_v60, 7  ;;  %v811_v63 = vrot.slane %v805_v60, 1 }
 0x275   : > { %v806_v1 = vrot.slane %v804_v61, 7  ;;  %v810_v3 = vrot.slane %v804_v61, 1  ;;  %1973 = vmatprep.mubr.msk.f32.mxu0 %vm266_vm2, %v804_v61 }
 0x276   : > { %1974 = vmatmul.mubr.msk.f32.vlgmr.msra.gmra.mrb[2].mxu0 %vm266_vm2, %v805_v60 }
 0x277   : > { %2123 = vmatpush3.bf16.msra.mxu0 %v2120_v49  ;;  %v809_v6 = vsel %vm177_vm0, %v807_v62, %v806_v1  ;;  %v808_v7 = vsel %vm177_vm0, %v806_v1, %v807_v62  ;;  %v812_v8 = vsel %vm182_vm1, %v810_v3, %v811_v63  ;;  %v813_v9 = vsel %vm182_vm1, %v811_v63, %v810_v3 }
 0x278   : > { %1984 = vmatprep.mubr.msk.f32.mxu0 %vm266_vm2, %v809_v6  ;;  %2125 = vmatprep.subr.bf16.mxu0 %v2124_v0  ;;  %v2164_v49 = vpack.c.bf16 %v1792_v48, %v1791_v47 }
 0x27b   : > { %2127 = vmatpush3.bf16.msra.mxu0 %v2124_v0  ;;  %v2172_v0 = vpack.c.bf16 %v1788_v59, %v1787_v58 }
 0x27c   : > { %2129 = vmatprep.subr.bf16.mxu0 %v2128_v10 }
 0x27e   : > { %1985 = vmatmul.mubr.msk.f32.vlgmr.msra.gmra.mrb[2].mxu0 %vm266_vm2, %v808_v7 }
 0x27f   : > { %2131 = vmatpush3.bf16.msra.mxu0 %v2128_v10  ;;  %1995 = vmatprep.mubr.msk.f32.mxu0 %vm266_vm2, %v812_v8  ;;  %v2176_v10 = vpack.c.bf16 %v1798_v5, %v1797_v4 }
 0x280   : > { %2133 = vmatprep.subr.bf16.mxu0 %v2132_v13 }
 0x283   : > { %2135 = vmatpush3.bf16.msra.mxu0 %v2132_v13  ;;  %v2180_v13 = vpack.c.bf16 %v1800_v12, %v1799_v11 }
 0x284   : > { %2161 = vmatprep.subr.bf16.mxu0 %v2160_v22 }
 0x286   : > { %1996 = vmatmul.mubr.msk.f32.vlgmr.msra.gmra.mrb[2].mxu0 %vm266_vm2, %v813_v9 }
 0x287   : > { %2163 = vmatpush3.bf16.msra.mxu0 %v2160_v22 }
 0x288   : > { %2165 = vmatprep.subr.bf16.mxu0 %v2164_v49 }
 0x28b   : > { %2167 = vmatpush3.bf16.msra.mxu0 %v2164_v49 }
 0x28c   : > { %2169 = vmatprep.subr.bf16.mxu0 %v2168_v52 }
 0x359   : > { %v1997_v24 = vpop.f32.mrb[2].mxu0 }
 0x35a   : > { %v1081_v25 = vadd.f32 %v1997_v24, %v1764_v23  ;;  %v1061_v26 = vpop.f32.mrb[3].mxu0 }
 0x35b   : > { %v1080_v27 = vadd.f32 %v1764_v23, %v1061_v26 }
 0x35c   : > { %v1083_v30 = vmax.f32 %v1081_v25, 0.0 }
 0x35d   : > { %v1082_v31 = vmax.f32 %v1080_v27, 0.0 }
 0x35e   : > { %v1085_v32 = vrot.slane %v1083_v30, 7  ;;  %v1089_v33 = vrot.slane %v1083_v30, 1 }
 0x35f   : > { %v1084_v35 = vrot.slane %v1082_v31, 7  ;;  %v1088_v36 = vrot.slane %v1082_v31, 1  ;;  %2006 = vmatprep.mubr.msk.f32.mxu1 %vm266_vm2, %v1082_v31 }
 0x360   : > { %2007 = vmatmul.mubr.msk.f32.vlgmr.msra.gmra.mrb[4].mxu1 %vm266_vm2, %v1083_v30 }
 0x361   : > { %2147 = vmatpush3.bf16.msra.mxu1 %v2144_v19  ;;  %v1087_v39 = vsel %vm177_vm0, %v1085_v32, %v1084_v35  ;;  %v1086_v40 = vsel %vm177_vm0, %v1084_v35, %v1085_v32  ;;  %v1090_v41 = vsel %vm182_vm1, %v1088_v36, %v1089_v33  ;;  %v1091_v42 = vsel %vm182_vm1, %v1089_v33, %v1088_v36 }
 0x362   : > { %2017 = vmatprep.mubr.msk.f32.mxu1 %vm266_vm2, %v1087_v39  ;;  %2149 = vmatprep.subr.bf16.mxu1 %v2148_v34 }
 0x365   : > { %2151 = vmatpush3.bf16.msra.mxu1 %v2148_v34 }
 0x366   : > { %2153 = vmatprep.subr.bf16.mxu1 %v2152_v43 }
 0x368   : > { %2018 = vmatmul.mubr.msk.f32.vlgmr.msra.gmra.mrb[4].mxu1 %vm266_vm2, %v1086_v40 }
 0x369   : > { %2155 = vmatpush3.bf16.msra.mxu1 %v2152_v43  ;;  %2028 = vmatprep.mubr.msk.f32.mxu1 %vm266_vm2, %v1090_v41 }
 0x36a   : > { %2157 = vmatprep.subr.bf16.mxu1 %v2156_v46 }
 0x36d   : > { %2159 = vmatpush3.bf16.msra.mxu1 %v2156_v46 }
 0x370   : > { %2029 = vmatmul.mubr.msk.f32.vlgmr.msra.gmra.mrb[4].mxu1 %vm266_vm2, %v1091_v42 }
 0x443   : > { %v2030_v54 = vpop.f32.mrb[4].mxu1 }
 0x444   : > { %v1359_v55 = vadd.f32 %v2030_v54, %v1784_v53  ;;  %v1339_v56 = vpop.f32.mrb[5].mxu1 }
 0x445   : > { %v1358_v57 = vadd.f32 %v1784_v53, %v1339_v56 }
 0x446   : > { %v1361_v60 = vmax.f32 %v1359_v55, 0.0 }
 0x447   : > { %v1360_v61 = vmax.f32 %v1358_v57, 0.0 }
 0x448   : > { %v1363_v62 = vrot.slane %v1361_v60, 7  ;;  %v1367_v63 = vrot.slane %v1361_v60, 1 }
 0x449   : > { %v1362_v1 = vrot.slane %v1360_v61, 7  ;;  %v1366_v3 = vrot.slane %v1360_v61, 1  ;;  %2039 = vmatprep.mubr.msk.f32.mxu0 %vm266_vm2, %v1360_v61 }
 0x44a   : > { %2040 = vmatmul.mubr.msk.f32.vlgmr.msra.gmra.mrb[4].mxu0 %vm266_vm2, %v1361_v60 }
 0x44b   : > { %2171 = vmatpush3.bf16.msra.mxu0 %v2168_v52  ;;  %v1365_v6 = vsel %vm177_vm0, %v1363_v62, %v1362_v1  ;;  %v1364_v7 = vsel %vm177_vm0, %v1362_v1, %v1363_v62  ;;  %v1368_v8 = vsel %vm182_vm1, %v1366_v3, %v1367_v63  ;;  %v1369_v9 = vsel %vm182_vm1, %v1367_v63, %v1366_v3 }
 0x44c   : > { %2050 = vmatprep.mubr.msk.f32.mxu0 %vm266_vm2, %v1365_v6  ;;  %2173 = vmatprep.subr.bf16.mxu0 %v2172_v0 }
 0x44f   : > { %2175 = vmatpush3.bf16.msra.mxu0 %v2172_v0 }
 0x450   : > { %2177 = vmatprep.subr.bf16.mxu0 %v2176_v10 }
 0x452   : > { %2051 = vmatmul.mubr.msk.f32.vlgmr.msra.gmra.mrb[4].mxu0 %vm266_vm2, %v1364_v7 }
 0x453   : > { %2179 = vmatpush3.bf16.msra.mxu0 %v2176_v10  ;;  %2061 = vmatprep.mubr.msk.f32.mxu0 %vm266_vm2, %v1368_v8 }
 0x454   : > { %2181 = vmatprep.subr.bf16.mxu0 %v2180_v13 }
 0x457   : > { %2183 = vmatpush3.bf16.msra.mxu0 %v2180_v13 }
 0x45a   : > { %2062 = vmatmul.mubr.msk.f32.vlgmr.msra.gmra.mrb[4].mxu0 %vm266_vm2, %v1369_v9 }
 0x52d   : > { %v2063_v14 = vpop.f32.mrb[4].mxu0 }
 0x52e   : > { %v1637_v15 = vadd.f32 %v2063_v14, %v1804_v2  ;;  %v1617_v16 = vpop.f32.mrb[5].mxu0 }
 0x52f   : > { %v1636_v17 = vadd.f32 %v1804_v2, %v1617_v16 }
 0x530   : > { %1639 = vst.msk [vmem:[%s170_s7 + $0x8] sm:$0xff] %vm266_vm2, %v1637_v15 }
 0x531   : > { %1638 = vst.msk [vmem:[%s170_s7] sm:$0xff] %vm266_vm2, %v1636_v17 }
 0x532 PF: > { %s13_s12 = sadd.s32 1, %s2221_s12  }
 0x533   : > { %p10_p4 = scmp.ge.s32.totalorder %s13_s12, 4  }
 0x535   :  { %12 = sbr.rel (!%p10_p4) target bundleno = 1 (0x1), region = 72 }

</bundles_post_ra>
